<compile_context>
chip_gen: v6e
topology: v6e:2x2x1
jax: 0.10.0
libtpu: 0.0.40
codegen_flags: <defaults>
</compile_context>

<pallas_src>
import functools

import jax
import jax.numpy as jnp
from jax.experimental import pallas as pl
from jax.experimental.pallas import tpu as pltpu


def _round_up(n: int, m: int) -> int:
    return ((n + m - 1) // m) * m


def _mlp_kernel(x_ref, w1_ref, b1_ref, w2_ref, b2_ref, w3_ref, b3_ref, o_ref):
    """Fused 3-layer MLP: (x @ W1 + b1).relu() @ W2 + b2).relu() @ W3 + b3."""
    cdt = w1_ref.dtype  # compute dtype fed to the MXU (bf16)

    # Layer 1: Linear + ReLU   (bf16 MXU inputs, f32 accumulation / elementwise)
    h = jnp.dot(x_ref[...], w1_ref[...], preferred_element_type=jnp.float32)
    h = jnp.maximum(h + b1_ref[...], 0.0)

    # Layer 2: Linear + ReLU
    h = jnp.dot(h.astype(cdt), w2_ref[...], preferred_element_type=jnp.float32)
    h = jnp.maximum(h + b2_ref[...], 0.0)

    # Layer 3: Linear (output layer, no activation). W3 is lane-padded to 128
    # output columns so this store is a full-lane (unmasked) vst.
    h = jnp.dot(h.astype(cdt), w3_ref[...], preferred_element_type=jnp.float32)
    o_ref[...] = (h + b3_ref[...]).astype(o_ref.dtype)


@functools.partial(jax.jit, static_argnames=("tile_b",))
def base_network_forward(x, params, *, tile_b: int = 512):
    """Fused sequential MLP forward (the BaseNetwork._hidden_layers pass)."""
    w1, b1, w2, b2, w3, b3 = params
    B, d_in = x.shape
    hid = w1.shape[1]
    d_out = w3.shape[1]
    compute_dtype = jnp.bfloat16

    # --- lane-dense output: pad d_out -> multiple of 128 -------------------
    d_out_p = _round_up(d_out, 128)
    w3p = jnp.pad(w3, ((0, 0), (0, d_out_p - d_out)))
    b3p = jnp.pad(b3, ((0, 0), (0, d_out_p - d_out)))

    # --- bf16 MXU inputs (weights + activations); biases stay f32 ----------
    xc = x.astype(compute_dtype)
    w1c = w1.astype(compute_dtype)
    w2c = w2.astype(compute_dtype)
    w3c = w3p.astype(compute_dtype)

    # --- batch tiling: multiple of 16 (bf16 sublane packing), pad batch ----
    TILE_B = _round_up(min(tile_b, _round_up(B, 16)), 16)
    Bp = _round_up(B, TILE_B)
    if Bp != B:
        xc = jnp.pad(xc, ((0, Bp - B), (0, 0)))
    grid = (Bp // TILE_B,)

    const = lambda i: (0, 0)  # weights/biases: same block every grid step (VMEM-resident)
    in_specs = [
        pl.BlockSpec((TILE_B, d_in), lambda i: (i, 0)),   # x: tiled over batch
        pl.BlockSpec((d_in, hid), const),                 # w1
        pl.BlockSpec((1, hid), const),                    # b1 (f32)
        pl.BlockSpec((hid, hid), const),                  # w2
        pl.BlockSpec((1, hid), const),                    # b2 (f32)
        pl.BlockSpec((hid, d_out_p), const),              # w3 (lane-padded)
        pl.BlockSpec((1, d_out_p), const),                # b3 (lane-padded, f32)
    ]
    out_specs = pl.BlockSpec((TILE_B, d_out_p), lambda i: (i, 0))

    flops = 2 * Bp * (d_in * hid + hid * hid + hid * d_out_p)
    bytes_accessed = (
        xc.size * 2                                    # bf16 activations in
        + (w1c.size + w2c.size + w3c.size) * 2         # bf16 weights
        + (b1.size + b2.size + b3p.size) * 4           # f32 biases
        + Bp * d_out_p * 4                             # f32 output
    )

    out = pl.pallas_call(
        _mlp_kernel,
        out_shape=jax.ShapeDtypeStruct((Bp, d_out_p), jnp.float32),
        grid=grid,
        in_specs=in_specs,
        out_specs=out_specs,
        compiler_params=pltpu.CompilerParams(
            dimension_semantics=("parallel",),   # 2x on v7x's dual TensorCores
        ),
        cost_estimate=pl.CostEstimate(
            flops=flops, transcendentals=0, bytes_accessed=bytes_accessed
        ),
    )(xc, w1c, b1, w2c, b2, w3c, b3p)

    # Strip batch padding and lane padding.
    return out[:B, :d_out]


def init_params(key, d_in=16, hidden=32, d_out=8):
    """Deterministic synthetic parameters (shapes match the nn.Linear layers)."""
    ks = jax.random.split(key, 6)
    w1 = jax.random.normal(ks[0], (d_in, hidden), jnp.float32) * 0.1
    b1 = jax.random.normal(ks[1], (1, hidden), jnp.float32) * 0.1
    w2 = jax.random.normal(ks[2], (hidden, hidden), jnp.float32) * 0.1
    b2 = jax.random.normal(ks[3], (1, hidden), jnp.float32) * 0.1
    w3 = jax.random.normal(ks[4], (hidden, d_out), jnp.float32) * 0.1
    b3 = jax.random.normal(ks[5], (1, d_out), jnp.float32) * 0.1
    return w1, b1, w2, b2, w3, b3


def reference_forward(x, params):
    """Pure-JAX fp32 reference of the same nn.Sequential forward."""
    w1, b1, w2, b2, w3, b3 = params
    h = jnp.maximum(x @ w1 + b1, 0.0)
    h = jnp.maximum(h @ w2 + b2, 0.0)
    return h @ w3 + b3


def reference_forward_matched(x, params, compute_dtype=jnp.bfloat16):
    """Pure-JAX reference applying the same bf16-input / f32-accumulate scheme."""
    w1, b1, w2, b2, w3, b3 = params
    h = jnp.dot(x.astype(compute_dtype), w1.astype(compute_dtype),
                preferred_element_type=jnp.float32)
    h = jnp.maximum(h + b1, 0.0)
    h = jnp.dot(h.astype(compute_dtype), w2.astype(compute_dtype),
                preferred_element_type=jnp.float32)
    h = jnp.maximum(h + b2, 0.0)
    h = jnp.dot(h.astype(compute_dtype), w3.astype(compute_dtype),
                preferred_element_type=jnp.float32)
    return h + b3


if __name__ == "__main__":
    key = jax.random.PRNGKey(0)
    k_x, k_p = jax.random.split(key)

    # Small test shapes (production use: large stacked batches, TILE_B ~ 512-2048).
    B, D_IN, HID, D_OUT = 100, 16, 32, 8
    x = jax.random.normal(k_x, (B, D_IN), jnp.float32)
    params = init_params(k_p, D_IN, HID, D_OUT)

    # tile_b=32 at B=100 exercises a 4-step batch grid plus batch padding.
    out = base_network_forward(x, params, tile_b=32)
    out = jax.block_until_ready(out)
    assert out.shape == (B, D_OUT)

    # Tight check vs a reference with identical bf16-input/f32-accumulate numerics.
    ref_matched = reference_forward_matched(x, params)
    assert jnp.allclose(out, ref_matched, atol=1e-3, rtol=1e-3)

    # Loose check vs the fp32 reference (bf16 quantization of inputs/weights).
    ref_f32 = reference_forward(x, params)
    assert jnp.allclose(out, ref_f32, atol=5e-2, rtol=5e-2)

    print("KERNEL_OK")
</pallas_src>

<mosaic_0001>
module attributes {stable_mosaic.version = 11 : i64} {
  func.func @_mlp_kernel(%arg0: i32, %arg1: memref<32x16xbf16, #tpu.memory_space<vmem>>, %arg2: memref<16x32xbf16, #tpu.memory_space<vmem>>, %arg3: memref<1x32xf32, #tpu.memory_space<vmem>>, %arg4: memref<32x32xbf16, #tpu.memory_space<vmem>>, %arg5: memref<1x32xf32, #tpu.memory_space<vmem>>, %arg6: memref<32x128xbf16, #tpu.memory_space<vmem>>, %arg7: memref<1x128xf32, #tpu.memory_space<vmem>>, %arg8: memref<32x128xf32, #tpu.memory_space<vmem>>) attributes {dimension_semantics = [#tpu.dimension_semantics<parallel>], iteration_bounds = array<i64: 4>, scalar_prefetch = 0 : i64, scratch_operands = 0 : i64, tpu.core_type = #tpu.core_type<tc>, window_params = [{transform_indices = @transform_0, window_bounds = array<i64: 32, 16>}, {pipeline_mode = #tpu.pipeline_mode<synchronous>, transform_indices = @transform_1, window_bounds = array<i64: 16, 32>}, {pipeline_mode = #tpu.pipeline_mode<synchronous>, transform_indices = @transform_2, window_bounds = array<i64: 1, 32>}, {pipeline_mode = #tpu.pipeline_mode<synchronous>, transform_indices = @transform_3, window_bounds = array<i64: 32, 32>}, {pipeline_mode = #tpu.pipeline_mode<synchronous>, transform_indices = @transform_4, window_bounds = array<i64: 1, 32>}, {pipeline_mode = #tpu.pipeline_mode<synchronous>, transform_indices = @transform_5, window_bounds = array<i64: 32, 128>}, {pipeline_mode = #tpu.pipeline_mode<synchronous>, transform_indices = @transform_6, window_bounds = array<i64: 1, 128>}, {transform_indices = @transform_7, window_bounds = array<i64: 32, 128>}]} {
    %c0 = arith.constant 0 : index
    %c0_0 = arith.constant 0 : index
    %0 = vector.load %arg1[%c0, %c0_0] : memref<32x16xbf16, #tpu.memory_space<vmem>>, vector<32x16xbf16>
    %c0_1 = arith.constant 0 : index
    %c0_2 = arith.constant 0 : index
    %1 = vector.load %arg2[%c0_1, %c0_2] : memref<16x32xbf16, #tpu.memory_space<vmem>>, vector<16x32xbf16>
    %cst = arith.constant dense<0.000000e+00> : vector<32x32xf32>
    %2 = tpu.matmul %0, %1, %cst {dimension_numbers = #tpu.dot_dimension_numbers<[1], [0], [0], [1], [0, 0, 1, 1], [], []>} : vector<32x16xbf16>, vector<16x32xbf16>, vector<32x32xf32> -> vector<32x32xf32>
    %c0_3 = arith.constant 0 : index
    %c0_4 = arith.constant 0 : index
    %3 = vector.load %arg3[%c0_3, %c0_4] : memref<1x32xf32, #tpu.memory_space<vmem>>, vector<1x32xf32>
    %4 = vector.broadcast %3 : vector<1x32xf32> to vector<32x32xf32>
    %5 = arith.addf %2, %4 : vector<32x32xf32>
    %cst_5 = arith.constant 0.000000e+00 : f32
    %6 = vector.broadcast %cst_5 : f32 to vector<32x32xf32>
    %7 = arith.maximumf %5, %6 : vector<32x32xf32>
    %8 = arith.truncf %7 : vector<32x32xf32> to vector<32x32xbf16>
    %c0_6 = arith.constant 0 : index
    %c0_7 = arith.constant 0 : index
    %9 = vector.load %arg4[%c0_6, %c0_7] : memref<32x32xbf16, #tpu.memory_space<vmem>>, vector<32x32xbf16>
    %cst_8 = arith.constant dense<0.000000e+00> : vector<32x32xf32>
    %10 = tpu.matmul %8, %9, %cst_8 {dimension_numbers = #tpu.dot_dimension_numbers<[1], [0], [0], [1], [0, 0, 1, 1], [], []>} : vector<32x32xbf16>, vector<32x32xbf16>, vector<32x32xf32> -> vector<32x32xf32>
    %c0_9 = arith.constant 0 : index
    %c0_10 = arith.constant 0 : index
    %11 = vector.load %arg5[%c0_9, %c0_10] : memref<1x32xf32, #tpu.memory_space<vmem>>, vector<1x32xf32>
    %12 = vector.broadcast %11 : vector<1x32xf32> to vector<32x32xf32>
    %13 = arith.addf %10, %12 : vector<32x32xf32>
    %cst_11 = arith.constant 0.000000e+00 : f32
    %14 = vector.broadcast %cst_11 : f32 to vector<32x32xf32>
    %15 = arith.maximumf %13, %14 : vector<32x32xf32>
    %16 = arith.truncf %15 : vector<32x32xf32> to vector<32x32xbf16>
    %c0_12 = arith.constant 0 : index
    %c0_13 = arith.constant 0 : index
    %17 = vector.load %arg6[%c0_12, %c0_13] : memref<32x128xbf16, #tpu.memory_space<vmem>>, vector<32x128xbf16>
    %cst_14 = arith.constant dense<0.000000e+00> : vector<32x128xf32>
    %18 = tpu.matmul %16, %17, %cst_14 {dimension_numbers = #tpu.dot_dimension_numbers<[1], [0], [0], [1], [0, 0, 1, 1], [], []>} : vector<32x32xbf16>, vector<32x128xbf16>, vector<32x128xf32> -> vector<32x128xf32>
    %c0_15 = arith.constant 0 : index
    %c0_16 = arith.constant 0 : index
    %19 = vector.load %arg7[%c0_15, %c0_16] : memref<1x128xf32, #tpu.memory_space<vmem>>, vector<1x128xf32>
    %20 = vector.broadcast %19 : vector<1x128xf32> to vector<32x128xf32>
    %21 = arith.addf %18, %20 : vector<32x128xf32>
    %c0_17 = arith.constant 0 : index
    %c0_18 = arith.constant 0 : index
    %22 = vector.load %arg8[%c0_17, %c0_18] : memref<32x128xf32, #tpu.memory_space<vmem>>, vector<32x128xf32>
    tpu.vector_store %arg8[%c0_17, %c0_18], %21 {strides = array<i32>} : memref<32x128xf32, #tpu.memory_space<vmem>>, vector<32x128xf32>,
    return
  }
  func.func @transform_0(%arg0: i32) -> (i32, i32) {
    %c0_i32 = arith.constant 0 : i32
    %c0_i32_0 = arith.constant 0 : i32
    return %arg0, %c0_i32 : i32, i32
  }
  func.func @transform_1(%arg0: i32) -> (i32, i32) {
    %c0_i32 = arith.constant 0 : i32
    %c0_i32_0 = arith.constant 0 : i32
    %c0_i32_1 = arith.constant 0 : i32
    return %c0_i32, %c0_i32_0 : i32, i32
  }
  func.func @transform_2(%arg0: i32) -> (i32, i32) {
    %c0_i32 = arith.constant 0 : i32
    %c0_i32_0 = arith.constant 0 : i32
    %c0_i32_1 = arith.constant 0 : i32
    return %c0_i32, %c0_i32_0 : i32, i32
  }
  func.func @transform_3(%arg0: i32) -> (i32, i32) {
    %c0_i32 = arith.constant 0 : i32
    %c0_i32_0 = arith.constant 0 : i32
    %c0_i32_1 = arith.constant 0 : i32
    return %c0_i32, %c0_i32_0 : i32, i32
  }
  func.func @transform_4(%arg0: i32) -> (i32, i32) {
    %c0_i32 = arith.constant 0 : i32
    %c0_i32_0 = arith.constant 0 : i32
    %c0_i32_1 = arith.constant 0 : i32
    return %c0_i32, %c0_i32_0 : i32, i32
  }
  func.func @transform_5(%arg0: i32) -> (i32, i32) {
    %c0_i32 = arith.constant 0 : i32
    %c0_i32_0 = arith.constant 0 : i32
    %c0_i32_1 = arith.constant 0 : i32
    return %c0_i32, %c0_i32_0 : i32, i32
  }
  func.func @transform_6(%arg0: i32) -> (i32, i32) {
    %c0_i32 = arith.constant 0 : i32
    %c0_i32_0 = arith.constant 0 : i32
    %c0_i32_1 = arith.constant 0 : i32
    return %c0_i32, %c0_i32_0 : i32, i32
  }
  func.func @transform_7(%arg0: i32) -> (i32, i32) {
    %c0_i32 = arith.constant 0 : i32
    %c0_i32_0 = arith.constant 0 : i32
    return %arg0, %c0_i32 : i32, i32
  }
}

</mosaic_0001>

<bundles_post_ra>
// kernel: base_network_forward.1
= control target key start
LH: loop header
LB: loop body
LE: loop exit
PB: predicated region body
PF: predicated region fallthrough
CT: control target
= control target key end

     0   :  { %s720_s24 = smov 0   ;;  %s769_s0 = inlined_call_operand.vmem [shape: bf16[128,16], index: 0, kind: input, shape index: {}]   ;;  %s770_s1 = inlined_call_operand.vmem [shape: bf16[16,32], index: 1, kind: input, shape index: {}]   ;;  %s771_s2 = inlined_call_operand.vmem [shape: f32[1,32], index: 2, kind: input, shape index: {}]   ;;  %s772_s3 = inlined_call_operand.vmem [shape: bf16[32,32], index: 3, kind: input, shape index: {}]   ;;  %s773_s4 = inlined_call_operand.vmem [shape: f32[1,32], index: 4, kind: input, shape index: {}]   ;;  %s774_s5 = inlined_call_operand.vmem [shape: bf16[32,128], index: 5, kind: input, shape index: {}]   ;;  %s775_s6 = inlined_call_operand.vmem [shape: f32[1,128], index: 6, kind: input, shape index: {}]   ;;  %s776_s7 = inlined_call_operand.vmem [shape: f32[128,128], index: 7, kind: output, shape index: {}]  }
   0x1 LB: > { %s597_s25 = sadd.s32 4294967295, %s678_s24   ;;  %p601_p0 = scmp.ge.s32.totalorder %s678_s24, 1  ;;  %s678_s24 = sphi %s720_s24, %s17_s24  }
   0x2   : > { %p238_p1 = scmp.lt.s32.totalorder %s678_s24, 5 }
   0x4   : > { %p239_p2 = pnand %p601_p0, %p238_p1 }
   0x5   : > { %s602_s28 = sshll.u32 (!%p239_p2), %s597_s25, 2 }
   0x6   : > { %242 = sbr.rel (%p239_p2) target bundleno = 630 (0x276), region = 48  ;;  %p271_p3 = scmp.lt.s32.totalorder (!%p239_p2), %s602_s28, 15 }
   0xb   : > { %v665_v0 = vld [vmem:[%s770_s1] sm:$0xff]   ;;  %s778_s28 = smov (!%p271_p3, %s602_s28), 15  ;;  %vm312_vm0 = vcmask 130048   ;;  %v668_v3 = vld [vmem:[%s772_s3 + $0x8] sm:$0xff]   ;;  %vm397_vm1 = vcmask 261120  }
   0xc   : > { %635 = vmatprep.subr.bf16.mxu0 %v665_v0  ;;  %s603_s29 = sshll.u32 %s778_s28, 2  ;;  %641 = vmatprep.subr.bf16.mxu1 %v668_v3  ;;  %v669_v4 = vld [vmem:[%s772_s3] sm:$0xff]   ;;  %v670_v20 = vld [vmem:[%s774_s5 + $0x8] sm:$0xff]   ;;  %s605_s22 = sshll.u32 %s778_s28, 3 }
   0xd   : > { %636 = vmatpush3.bf16.msra.mxu0 %v665_v0  ;;  %s274_s9 = scalar_lea.vmem %s769_s0, %s603_s29  ;;  %642 = vmatpush3.bf16.msra.mxu1 %v668_v3  ;;  %v606_v7 = vld [vmem:[%s771_s2] ss:$0 sm:$0xff]  ;;  %s280_s29 = scalar_lea.vmem %s776_s7, %s605_s22 }
   0xe   : > { %v666_v1 = vld [vmem:[%s274_s9] sm:$0xff]   ;;  %v667_v2 = vld [vmem:[%s274_s9 + $0x8] sm:$0xff]   ;;  %643 = vmatprep.subr.bf16.mxu1 %v669_v4  ;;  %649 = vmatprep.subr.bf16.mxu0 %v670_v20 }
   0xf   : > { %637 = vmatprep.mubr.msk.bf16.mxu0 %vm312_vm0, %v666_v1  ;;  %v671_v21 = vld [vmem:[%s774_s5] sm:$0xff]  }
  0x10   : > { %638 = vmatmul.mubr.msk.bf16.vlgmr.msra.gmra.mxu0 %vm312_vm0, %v667_v2  ;;  %v612_v24 = vld [vmem:[%s773_s4] ss:$0 sm:$0xff] }
  0x11   : > { %644 = vmatpush3.bf16.msra.mxu1 %v669_v4  ;;  %650 = vmatpush3.bf16.msra.mxu0 %v670_v20  ;;  %v617_v37 = vld [vmem:[%s775_s6] ss:$0 sm:$0xff] }
  0x12   : > { %651 = vmatprep.subr.bf16.mxu0 %v671_v21 }
  0x15   : > { %652 = vmatpush3.bf16.msra.mxu0 %v671_v21 }
  0xd0   : > { %v639_v5 = vpop.f32.mrf.mxu0 }
  0xd1   : > { %v362_v11 = vadd.f32 %v639_v5, %v606_v7 }
  0xd2   : > { %v353_v6 = vpop.f32.mrf.mxu0 }
  0xd3   : > { %v354_v9 = vadd.f32 %v606_v7, %v353_v6  ;;  %v370_v17 = vmax.f32 %v362_v11, 0.0 }
  0xd4   : > { %v640_v8 = vpop.f32.mrf.mxu0 }
  0xd5   : > { %v365_v10 = vadd.f32 %v640_v8, %v606_v7  ;;  %v368_v15 = vmax.f32 %v354_v9, 0.0 }
  0xd6   : > { %v356_v12 = vpop.f32.mrf.mxu0 }
  0xd7   : > { %v357_v13 = vadd.f32 %v606_v7, %v356_v12  ;;  %v371_v14 = vmax.f32 %v365_v10, 0.0 }
  0xd9   : > { %v369_v16 = vmax.f32 %v357_v13, 0.0  ;;  %v373_v19 = vpack.c.bf16 %v371_v14, %v370_v17 }
  0xdb   : > { %v372_v18 = vpack.c.bf16 %v369_v16, %v368_v15 }
  0xdd   : > { %645 = vmatprep.mubr.msk.bf16.mxu1 %vm397_vm1, %v372_v18 }
  0xde   : > { %646 = vmatmul.mubr.msk.bf16.vlgmr.msra.gmra.mxu1 %vm397_vm1, %v373_v19 }
 0x19e   : > { %v647_v22 = vpop.f32.mrf.mxu1 }
 0x19f   : > { %v447_v28 = vadd.f32 %v647_v22, %v612_v24 }
 0x1a0   : > { %v438_v23 = vpop.f32.mrf.mxu1 }
 0x1a1   : > { %v439_v26 = vadd.f32 %v612_v24, %v438_v23  ;;  %v455_v34 = vmax.f32 %v447_v28, 0.0 }
 0x1a2   : > { %v648_v25 = vpop.f32.mrf.mxu1 }
 0x1a3   : > { %v450_v27 = vadd.f32 %v648_v25, %v612_v24  ;;  %v453_v32 = vmax.f32 %v439_v26, 0.0 }
 0x1a4   : > { %v441_v29 = vpop.f32.mrf.mxu1 }
 0x1a5   : > { %v442_v30 = vadd.f32 %v612_v24, %v441_v29  ;;  %v456_v31 = vmax.f32 %v450_v27, 0.0 }
 0x1a7   : > { %v454_v33 = vmax.f32 %v442_v30, 0.0  ;;  %v458_v36 = vpack.c.bf16 %v456_v31, %v455_v34 }
 0x1a9   : > { %v457_v35 = vpack.c.bf16 %v454_v33, %v453_v32 }
 0x1ab   : > { %653 = vmatprep.mubr.msk.bf16.mxu0 %vm397_vm1, %v457_v35 }
 0x1ac   : > { %654 = vmatmul.mubr.msk.bf16.vlgmr.msra.gmra.mxu0 %vm397_vm1, %v458_v36 }
 0x26c   : > { %v655_v38 = vpop.f32.mrf.mxu0 }
 0x26d   : > { %v531_v39 = vadd.f32 %v655_v38, %v617_v37 }
 0x26e   : > { %v522_v40 = vpop.f32.mrf.mxu0 }
 0x26f   : > { %539 = vst [vmem:[%s280_s29 + $0x10] sm:$0xff] %v531_v39  ;;  %v523_v41 = vadd.f32 %v617_v37, %v522_v40 }
 0x270   : > { %v656_v42 = vpop.f32.mrf.mxu0 }
 0x271   : > { %537 = vst [vmem:[%s280_s29] sm:$0xff] %v523_v41  ;;  %v534_v43 = vadd.f32 %v656_v42, %v617_v37 }
 0x272   : > { %v525_v44 = vpop.f32.mrf.mxu0 }
 0x273   : > { %540 = vst [vmem:[%s280_s29 + $0x18] sm:$0xff] %v534_v43  ;;  %v526_v45 = vadd.f32 %v617_v37, %v525_v44 }
 0x275   : > { %538 = vst [vmem:[%s280_s29 + $0x8] sm:$0xff] %v526_v45 }
 0x276 PF: > { %s17_s24 = sadd.s32 1, %s678_s24  }
 0x277   : > { %p14_p4 = scmp.ge.s32.totalorder %s17_s24, 6  }
 0x279   :  { %16 = sbr.rel (!%p14_p4) target bundleno = 1 (0x1), region = 78 }

</bundles_post_ra>
